<compile_context>
chip_gen: v7x
topology: tpu7x:2x2x1
jax: 0.10.0
libtpu: 0.0.40
codegen_flags: <defaults>
</compile_context>

<pallas_src>
import functools
import math

import jax
import jax.numpy as jnp
from jax.experimental import pallas as pl
from jax.experimental.pallas import tpu as pltpu


def _round_up(x, m):
    return ((x + m - 1) // m) * m


def _masked_rowsum_kernel(pred_ref, ones_ref, mask_ref, out_ref, acc_ref,
                          *, v_rem, n_rem):
    """Accumulates  sum_{rows} mask_r * sum_{vocab} pred[r, v]  per token tile.

    Grid = (token_tiles, vocab_tiles); vocab axis is the inner reduction axis.
    acc_ref: (tile_n, 128) f32 per-row sums (all 128 lanes identical).
    Output: one lane-dense (8, 128) f32 partial per token tile.
    """
    i = pl.program_id(0)
    k = pl.program_id(1)
    kt = pl.num_programs(1)

    @pl.when(k == 0)
    def _():
        acc_ref[...] = jnp.zeros_like(acc_ref)

    def accumulate(pred):
        # MXU ones-matmul: row sums land in all 128 output lanes; accumulate f32.
        acc_ref[...] += jnp.dot(pred, ones_ref[...],
                                preferred_element_type=jnp.float32)

    if v_rem:
        # Vocab tail exists (static): zero the out-of-range lanes only on the
        # last vocab tile; all other steps take the select-free fast path.
        @pl.when(k < kt - 1)
        def _():
            accumulate(pred_ref[...])

        @pl.when(k == kt - 1)
        def _():
            lane = jax.lax.broadcasted_iota(jnp.int32, pred_ref.shape, 1)
            accumulate(jnp.where(lane < v_rem, pred_ref[...], 0)
                       .astype(pred_ref.dtype))
    else:
        accumulate(pred_ref[...])

    @pl.when(k == kt - 1)
    def _():
        # Apply mask to per-row sums (once per token tile, not per element).
        masked = acc_ref[...] * mask_ref[...]          # (tile_n, 128)
        if n_rem:
            nt = pl.num_programs(0)
            row = jax.lax.broadcasted_iota(jnp.int32, masked.shape, 0)
            limit = jnp.where(i == nt - 1, n_rem, masked.shape[0])
            masked = jnp.where(row < limit, masked, 0.0)
        tn = masked.shape[0]
        # Sublane fold -> lane-dense (8, 128) partial (lanes identical).
        out_ref[0] = masked.reshape(tn // 8, 8, 128).sum(axis=0)


def loss_with_ls(prediction, target, mask, *, size, smooth,
                 tile_n=None, tile_v=None):
    """prediction: (B, T, V) log-probs; target: (B, T) int; mask: (B, T)."""
    B, T, V = prediction.shape
    assert V == size
    N = B * T

    # Keep HBM dtype on the wire (bf16 stays bf16); MXU consumes it natively.
    pred2 = prediction.reshape(N, V)
    tgt_flat = target.reshape(N).astype(jnp.int32)
    mask_flat = mask.reshape(N).astype(jnp.float32)
    msk2 = mask_flat.reshape(N, 1)
    itemsize = jnp.dtype(pred2.dtype).itemsize

    # ---- VMEM-capacity-aware budgets (v7x 64 MiB vs v5e/v6e 128 MiB) -------
    try:
        vmem_cap = int(pltpu.get_tpu_info().vmem_capacity_bytes)
    except Exception:
        vmem_cap = 64 << 20                      # conservative default
    big_vmem = vmem_cap >= (96 << 20)
    pred_budget = (40 << 20) if big_vmem else (16 << 20)
    tile_v_cap = 8192 if big_vmem else 4096
    vmem_limit_cap = (96 << 20) if big_vmem else (36 << 20)

    # ---- vocab tiling (prefer a divisor of round_up(V,128) within the cap) --
    V128 = _round_up(V, 128)
    if tile_v is None:
        tile_v = 128
        for cand in range(min(V128, tile_v_cap), 127, -128):
            if V128 % cand == 0:
                tile_v = cand
                break
    else:
        assert tile_v % 128 == 0

    # ---- token tiling (largest double-buffered pred block within budget) ---
    if tile_n is None:
        cap_rows = (pred_budget // (2 * tile_v * itemsize)) // 8 * 8
        cap_rows = max(8, min(1024, cap_rows))
        cap_rows = min(cap_rows, _round_up(N, 8))
        if N >= 16:
            # Guarantee >= 2 token tiles so v7x can use both TensorCores.
            cap_rows = min(cap_rows, max(8, ((N - 1) // 8) * 8))
        tile_n = None
        for cand in range(cap_rows, 7, -8):      # prefer no row tail
            if N % cand == 0:
                tile_n = cand
                break
        if tile_n is None:
            tile_n = cap_rows
    assert tile_n % 8 == 0

    nt = (N + tile_n - 1) // tile_n
    kt = (V + tile_v - 1) // tile_v
    n_rem = N % tile_n                           # 0 => no row tail
    v_rem = V % tile_v                           # 0 => no vocab tail

    # ---- label-smoothing constants (entropy folded at compile time) --------
    confidence = 1.0 - smooth
    smooth_off = smooth / (size - 1) if size > 1 else 0.0
    h_const = 0.0
    if confidence > 0.0:
        h_const += confidence * math.log(confidence)
    if smooth_off > 0.0:
        h_const += (size - 1) * smooth_off * math.log(smooth_off)

    # ---- resident ones operand for the MXU vocab reduction -----------------
    ones = jnp.ones((tile_v, 128), dtype=pred2.dtype)

    # ---- VMEM limit sized for the chosen tiles ------------------------------
    vmem_bytes = (2 * tile_n * tile_v * itemsize          # pred double-buffer
                  + 2 * tile_v * 128 * itemsize           # ones operand
                  + 2 * tile_n * 128 * 4                  # mask (lane-padded)
                  + 2 * 8 * 128 * 4                       # output
                  + 2 * tile_n * 128 * 4                  # acc scratch + temp
                  + (tile_n * tile_v * itemsize if v_rem else 0)
                  + (2 << 20))                            # headroom
    vmem_limit = int(min(max(vmem_bytes, 16 << 20), vmem_limit_cap))

    cost = pl.CostEstimate(
        flops=2 * N * V,
        transcendentals=0,
        bytes_accessed=N * V * itemsize + N * 4 + nt * 8 * 128 * 4
                       + tile_v * 128 * itemsize)

    kernel = functools.partial(_masked_rowsum_kernel, v_rem=v_rem, n_rem=n_rem)

    partials = pl.pallas_call(
        kernel,
        out_shape=jax.ShapeDtypeStruct((nt, 8, 128), jnp.float32),
        grid_spec=pltpu.PrefetchScalarGridSpec(
            num_scalar_prefetch=0,
            grid=(nt, kt),
            in_specs=[
                pl.BlockSpec((tile_n, tile_v), lambda i, k: (i, k)),  # pred tile
                pl.BlockSpec((tile_v, 128), lambda i, k: (0, 0)),     # ones (resident)
                pl.BlockSpec((tile_n, 1), lambda i, k: (i, 0)),       # mask column
            ],
            out_specs=pl.BlockSpec((1, 8, 128), lambda i, k: (i, 0, 0)),
            scratch_shapes=[pltpu.VMEM((tile_n, 128), jnp.float32)],
        ),
        compiler_params=pltpu.CompilerParams(
            dimension_semantics=("parallel", "arbitrary"),
            vmem_limit_bytes=vmem_limit),
        cost_estimate=cost,
    )(pred2, ones, msk2)

    # All 128 lanes of each partial are identical; take lane 0.
    masked_rowsum_total = jnp.sum(partials[:, :, 0])     # sum_r mask_r * sum_v pred

    # Target-gather term (O(N) elements) done in plain JAX, per the review.
    gathered = jnp.take_along_axis(pred2, tgt_flat[:, None], axis=1)[:, 0]
    gather_term = jnp.sum(gathered.astype(jnp.float32) * mask_flat)

    cross = smooth_off * masked_rowsum_total + (confidence - smooth_off) * gather_term
    mask_sum = jnp.sum(mask_flat)
    # loss = sum_r mask_r * (H_const - sum_v labels*pred) / sum_r mask_r
    # (division is unguarded to match the reference module's semantics)
    return (h_const * mask_sum - cross) / mask_sum


def _reference(prediction, target, mask, *, size, smooth):
    """Pure-JAX reference mirroring the (intended) PyTorch forward."""
    V = size
    pred2 = prediction.reshape(-1, V).astype(jnp.float32)
    tgt2 = target.reshape(-1)
    m2 = mask.reshape(-1).astype(jnp.float32)
    off = smooth / (V - 1)
    conf = 1.0 - smooth
    labels = jnp.full_like(pred2, off)
    labels = labels.at[jnp.arange(pred2.shape[0]), tgt2].set(conf)
    kl = labels * (jnp.log(labels) - pred2)
    return (kl.sum(1) * m2).sum() / m2.sum()


if __name__ == "__main__":
    key = jax.random.PRNGKey(0)
    B, T, V = 2, 8, 128          # batch, max_words, vocab_size
    smooth = 0.1

    k1, k2, k3 = jax.random.split(key, 3)
    logits = jax.random.normal(k1, (B, T, V), jnp.float32)
    prediction = jax.nn.log_softmax(logits, axis=-1)   # KLDivLoss expects log-probs
    target = jax.random.randint(k2, (B, T), 0, V, dtype=jnp.int32)
    mask = (jax.random.uniform(k3, (B, T)) > 0.3).astype(jnp.float32)
    mask = mask.at[0, 0].set(1.0)                      # guarantee non-zero denominator

    loss = loss_with_ls(prediction, target, mask, size=V, smooth=smooth)
    loss = jax.block_until_ready(loss)

    expected = _reference(prediction, target, mask, size=V, smooth=smooth)
    assert jnp.allclose(loss, expected, rtol=1e-5, atol=1e-4), (loss, expected)

    print("KERNEL_OK")
</pallas_src>

<mosaic_0001>
module attributes {stable_mosaic.version = 11 : i64} {
  func.func @_masked_rowsum_kernel(%arg0: i32, %arg1: i32, %arg2: memref<8x128xf32, #tpu.memory_space<vmem>>, %arg3: memref<128x128xf32, #tpu.memory_space<vmem>>, %arg4: memref<8x1xf32, #tpu.memory_space<vmem>>, %arg5: memref<1x8x128xf32, #tpu.memory_space<vmem>>, %arg6: memref<8x128xf32, #tpu.memory_space<vmem>>) attributes {dimension_semantics = [#tpu.dimension_semantics<parallel>, #tpu.dimension_semantics<arbitrary>], iteration_bounds = array<i64: 2, 1>, scalar_prefetch = 0 : i64, scratch_operands = 1 : i64, tpu.core_type = #tpu.core_type<tc>, window_params = [{transform_indices = @transform_0, window_bounds = array<i64: 8, 128>}, {pipeline_mode = #tpu.pipeline_mode<synchronous>, transform_indices = @transform_1, window_bounds = array<i64: 128, 128>}, {transform_indices = @transform_2, window_bounds = array<i64: 8, 1>}, {transform_indices = @transform_3, window_bounds = array<i64: 1, 8, 128>}]} {
    %c0_i32 = arith.constant 0 : i32
    %0 = arith.cmpi eq, %arg1, %c0_i32 : i32
    %1 = arith.extui %0 : i1 to i32
    %c0_i32_0 = arith.constant 0 : i32
    %2 = arith.cmpi ne, %1, %c0_i32_0 : i32
    scf.if %2 {
      %cst_10 = arith.constant 0.000000e+00 : f32
      %12 = vector.broadcast %cst_10 : f32 to vector<8x128xf32>
      %c0_11 = arith.constant 0 : index
      %c0_12 = arith.constant 0 : index
      %13 = vector.load %arg6[%c0_11, %c0_12] : memref<8x128xf32, #tpu.memory_space<vmem>>, vector<8x128xf32>
      tpu.vector_store %arg6[%c0_11, %c0_12], %12 {strides = array<i32>} : memref<8x128xf32, #tpu.memory_space<vmem>>, vector<8x128xf32>,
    } else {
    }
    %c0 = arith.constant 0 : index
    %c0_1 = arith.constant 0 : index
    %3 = vector.load %arg2[%c0, %c0_1] : memref<8x128xf32, #tpu.memory_space<vmem>>, vector<8x128xf32>
    %c0_2 = arith.constant 0 : index
    %c0_3 = arith.constant 0 : index
    %4 = vector.load %arg6[%c0_2, %c0_3] : memref<8x128xf32, #tpu.memory_space<vmem>>, vector<8x128xf32>
    %c0_4 = arith.constant 0 : index
    %c0_5 = arith.constant 0 : index
    %5 = vector.load %arg3[%c0_4, %c0_5] : memref<128x128xf32, #tpu.memory_space<vmem>>, vector<128x128xf32>
    %cst = arith.constant dense<0.000000e+00> : vector<8x128xf32>
    %6 = tpu.matmul %3, %5, %cst {dimension_numbers = #tpu.dot_dimension_numbers<[1], [0], [0], [1], [0, 0, 1, 1], [], []>} : vector<8x128xf32>, vector<128x128xf32>, vector<8x128xf32> -> vector<8x128xf32>
    %7 = arith.addf %4, %6 : vector<8x128xf32>
    %c0_6 = arith.constant 0 : index
    %c0_7 = arith.constant 0 : index
    %8 = vector.load %arg6[%c0_6, %c0_7] : memref<8x128xf32, #tpu.memory_space<vmem>>, vector<8x128xf32>
    tpu.vector_store %arg6[%c0_6, %c0_7], %7 {strides = array<i32>} : memref<8x128xf32, #tpu.memory_space<vmem>>, vector<8x128xf32>,
    %c0_i32_8 = arith.constant 0 : i32
    %9 = arith.cmpi eq, %arg1, %c0_i32_8 : i32
    %10 = arith.extui %9 : i1 to i32
    %c0_i32_9 = arith.constant 0 : i32
    %11 = arith.cmpi ne, %10, %c0_i32_9 : i32
    scf.if %11 {
      %c0_10 = arith.constant 0 : index
      %c0_11 = arith.constant 0 : index
      %12 = vector.load %arg6[%c0_10, %c0_11] : memref<8x128xf32, #tpu.memory_space<vmem>>, vector<8x128xf32>
      %c0_12 = arith.constant 0 : index
      %c0_13 = arith.constant 0 : index
      %13 = vector.load %arg4[%c0_12, %c0_13] : memref<8x1xf32, #tpu.memory_space<vmem>>, vector<8x1xf32>
      %14 = vector.broadcast %13 : vector<8x1xf32> to vector<8x128xf32>
      %15 = arith.mulf %12, %14 : vector<8x128xf32>
      %16 = vector.shape_cast %15 : vector<8x128xf32> to vector<1x8x128xf32>
      %cst_14 = arith.constant dense<0.000000e+00> : vector<8x128xf32>
      %17 = vector.multi_reduction <add>, %16, %cst_14 [0] : vector<1x8x128xf32> to vector<8x128xf32>
      %c0_15 = arith.constant 0 : index
      %c0_16 = arith.constant 0 : index
      %c0_17 = arith.constant 0 : index
      %18 = vector.load %arg5[%c0_15, %c0_16, %c0_17] : memref<1x8x128xf32, #tpu.memory_space<vmem>>, vector<1x8x128xf32>
      %19 = vector.shape_cast %18 : vector<1x8x128xf32> to vector<8x128xf32>
      %20 = vector.shape_cast %17 : vector<8x128xf32> to vector<1x8x128xf32>
      tpu.vector_store %arg5[%c0_15, %c0_16, %c0_17], %20 {strides = array<i32>} : memref<1x8x128xf32, #tpu.memory_space<vmem>>, vector<1x8x128xf32>,
    } else {
    }
    return
  }
  func.func @transform_0(%arg0: i32, %arg1: i32) -> (i32, i32) {
    %c0_i32 = arith.constant 0 : i32
    return %arg0, %arg1 : i32, i32
  }
  func.func @transform_1(%arg0: i32, %arg1: i32) -> (i32, i32) {
    %c0_i32 = arith.constant 0 : i32
    %c0_i32_0 = arith.constant 0 : i32
    %c0_i32_1 = arith.constant 0 : i32
    return %c0_i32, %c0_i32_0 : i32, i32
  }
  func.func @transform_2(%arg0: i32, %arg1: i32) -> (i32, i32) {
    %c0_i32 = arith.constant 0 : i32
    %c0_i32_0 = arith.constant 0 : i32
    return %arg0, %c0_i32 : i32, i32
  }
  func.func @transform_3(%arg0: i32, %arg1: i32) -> (i32, i32, i32) {
    %c0_i32 = arith.constant 0 : i32
    %c0_i32_0 = arith.constant 0 : i32
    %c0_i32_1 = arith.constant 0 : i32
    return %arg0, %c0_i32, %c0_i32_0 : i32, i32, i32
  }
}

</mosaic_0001>

<bundles_post_ra>
// kernel: tpu_custom_call.1
= control target key start
LH: loop header
LB: loop body
LE: loop exit
PB: predicated region body
PF: predicated region fallthrough
CT: control target
= control target key end

     0   :  { %8 = vsyncpa [#allocation4], 0  ;;  %s900_s0 = inlined_call_operand.vmem [shape: f32[16,128], index: 0, kind: input, shape index: {}]   ;;  %s901_s1 = inlined_call_operand.hbm [shape: f32[128,128], index: 1, kind: input, shape index: {}]   ;;  %s902_s2 = inlined_call_operand.vmem [shape: f32[16,1], index: 2, kind: input, shape index: {}]   ;;  %s903_s3 = inlined_call_operand.hbm [shape: f32[2,8,128], index: 3, kind: output, shape index: {}]  }
   0x1   :  { %9 = vsyncpa [#allocation5], 0 }
   0x2   :  { %11 = vsyncpa [#allocation5 + $0x1], 0  ;;  %s740_s12 = smov 0   ;;  %s742_s13 = smov 0  }
   0x3   :  { %s744_s14 = smov 0   ;;  %s746_s15 = smov 0  }
   0x4   :  { %s748_s16 = smov 0   ;;  %s750_s17 = smov 0  }
   0x5 LB: > { %s437_s18 = sadd.s32 4294967295, %s710_s17   ;;  %s438_s19 = sadd.s32 4294967294, %s710_s17   ;;  %s710_s17 = sphi %s750_s17, %s17_s17   ;;  %s706_s16 = sphi %s748_s16, %s921_s16   ;;  %s702_s15 = sphi %s746_s15, %s920_s15   ;;  %s698_s14 = sphi %s744_s14, %s919_s14   ;;  %s694_s13 = sphi %s742_s13, %s918_s13   ;;  %s690_s12 = sphi %s740_s12, %s917_s12  }
   0x6   : > { %s29_s20 = sadd.s32 1, %s706_s16  ;;  %s111_s21 = sadd.s32 1, %s698_s14 }
   0x7   : > { %p31_p0 = scmp.ge.s32.totalorder %s29_s20, 2  ;;  %p121_p1 = scmp.ne.s32.totalorder %s698_s14, %s694_s13 }
   0x8   : > { %p122_p2 = scmp.eq.s32.totalorder %s437_s18, 1  ;;  %p127_p3 = scmp.ne.s32.totalorder %s694_s13, %s690_s12 }
   0x9   : > { %s923_s20 = smov (%p31_p0, %s29_s20), 0  ;;  %p128_p5 = scmp.eq.s32.totalorder %s438_s19, 1 }
   0xa   : > { %p780_p4 = por %p122_p2, %p121_p1  ;;  %s108_s23 = ssub.s32 %s706_s16, %s923_s20 }
   0xb   : > { %p439_p6 = scmp.ge.s32.totalorder %s710_s17, 1  ;;  %p109_p7 = scmp.eq.s32.totalorder %s108_s23, 0 }
   0xc   : > { %s908_s22 = scalar_select %p780_p4, 1, 0 }
   0xd   : > { %p787_p8 = por %p128_p5, %p127_p3  ;;  %p135_p9 = scmp.lt.s32.totalorder %s710_s17, 3 }
   0xe   : > { %s793_s25 = scalar_select %p109_p7, %s698_s14, %s111_s21  }
   0xf   : > { %s909_s24 = scalar_select %p787_p8, 1, 0 }
  0x10   : > { %p795_p10 = pnand %p439_p6, %p135_p9  ;;  %p799_p11 = scmp.eq.s32.totalorder %s437_s18, 0 }
  0x11   : > { %s712_s28 = smov [#allocation3]   ;;  %s600_s6 = scalar_lea.hbm %s901_s1, 2048 }
  0x12   : > { %s910_s26 = scalar_select %p795_p10, 1, 0 }
  0x13   : > { %s911_s27 = scalar_select %p799_p11, 1, 0 }
  0x14   : > { %p533_p12 = pneg %p795_p10  ;;  %s147_s29 = sshll.u32 %s712_s28, 4  ;;  %s148_s29 = int_to_ptr.vmem [resolvable:$true] %s147_s29 }
  0x15   : > { %p601_p0 = scmp.ne.s32.totalorder %s901_s1, %s600_s6  ;;  %p607_p5 = scmp.lt.u32.totalorder %s600_s6, %s901_s1 }
  0x16   : > { %p807_p13 = pnand %p799_p11, %p533_p12 }
  0x18   : > { %p602_p1 = pneg %p807_p13 }
  0x1a   : > { %p603_p2 = pnand %p602_p1, %p601_p0 }
  0x1c   : > { %p604_p3 = pneg %p603_p2 }
  0x1e   : > { %p609_p6 = pnand %p607_p5, %p604_p3 }
  0x20   : > { %612 = shalt.err (!%p609_p6)
}
  0x21   : > { %s613_s11 = scalar_lea.vmem %s148_s29, 2048  ;;  %p621_p8 = scmp.lt.s32.totalorder %s148_s29, %s148_s29 }
  0x22   : > { %p614_p7 = scmp.ne.s32.totalorder %s148_s29, %s613_s11  ;;  %p622_p4 = scmp.lt.s32.totalorder %s613_s11, %s613_s11 }
  0x24   : > { %p616_p9 = pnand %p614_p7, %p602_p1  ;;  %p623_p11 = por %p622_p4, %p621_p8 }
  0x26   : > { %p617_p12 = pneg %p616_p9 }
  0x28   : > { %p624_p10 = pnand %p623_p11, %p617_p12 }
  0x2a   : > { %627 = shalt.err (!%p624_p10)
}
  0x2b   : > { %s713_s18 = smov 128   ;;  %s714_s19 = smov 8  }
  0x2c   : > { %536 = dma.hbm_to_vmem [thread:$0]  (!%p807_p13), %s901_s1, 2048, %s148_s29, [#allocation4], %s713_s18, %s713_s18, %s714_s19  }
  0x2d   : > { %p913_p0 = scmp.ne.s32.totalorder %s910_s26, 0 }
  0x2e   : > { %p914_p2 = scmp.ne.s32.totalorder (!%p913_p0), %s911_s27, 0 }
  0x2f   : > { %180 = sbr.rel (%p913_p0) target bundleno = 318 (0x13e), region = 32 }
  0x36   : > { %681 = dma.done.wait (%p914_p2), [#allocation4], 2048  }
  0x37   : > { %683 = vsyncadd (%p914_p2), [#allocation4], 4294965248  ;;  %p210_p4 = scmp.lt.s32.totalorder %s702_s15, 1  ;;  %v715_v0 = vmov 0.0|0.0   ;;  %vm716_vm0 = vmmov 0   ;;  %v717_v1 = vmov 0.0  }
  0x38   : > { %503 = vmatprep.subr.bf16.mxu0 %v715_v0  ;;  %500 = vmatprep.mubr.msk.f32.mxu0 %vm716_vm0, %v717_v1  ;;  %v718_v2 = vmov 0   ;;  %v228_v3 = vld [vmem:[#allocation3] sm:$0xff]  ;;  %v229_v4 = vld [vmem:[#allocation3 + $0x8] sm:$0xff]  ;;  %v230_v5 = vld [vmem:[#allocation3 + $0x10] sm:$0xff]  ;;  %s207_s7 = sand.u32 1, %s694_s13   ;;  %s448_s9 = sshll.u32 %s702_s15, 7 }
  0x39   : > { %599 = vset.pattern.permute.xlu0 %v718_v2  ;;  %s835_s28 = scalar_select %p210_p4, %s702_s15, 1  ;;  %v504_v6 = vpack.c.bf16 %v229_v4, %v228_v3  ;;  %v231_v7 = vld [vmem:[#allocation3 + $0x18] sm:$0xff]  ;;  %v232_v9 = vld [vmem:[#allocation3 + $0x20] sm:$0xff]  ;;  %v233_v10 = vld [vmem:[#allocation3 + $0x28] sm:$0xff] }
  0x3a   : > { %v507_v8 = vpack.c.bf16 %v231_v7, %v230_v5  ;;  %v510_v12 = vpack.c.bf16 %v233_v10, %v232_v9  ;;  %v234_v13 = vld [vmem:[#allocation3 + $0x30] sm:$0xff]  ;;  %v235_v14 = vld [vmem:[#allocation3 + $0x38] sm:$0xff]  ;;  %v236_v16 = vld [vmem:[#allocation3 + $0x40] sm:$0xff]  ;;  %s444_s8 = sshll.u32 %s207_s7, 3  ;;  %s853_s21 = scalar_lea.hbm %s903_s3, %s448_s9 }
  0x3b   : > { %s445_s26 = sshll.u32 %s835_s28, 3  ;;  %505 = vmatpush3.bf16.msra.mxu0 %v504_v6  ;;  %v513_v15 = vpack.c.bf16 %v235_v14, %v234_v13  ;;  %v237_v17 = vld [vmem:[#allocation3 + $0x48] sm:$0xff]  ;;  %v238_v19 = vld [vmem:[#allocation3 + $0x50] sm:$0xff]  ;;  %v239_v20 = vld [vmem:[#allocation3 + $0x58] sm:$0xff]  ;;  %s209_s10 = scalar_lea.vmem [#allocation6], %s444_s8 }
  0x3c   : > { %s220_s30 = scalar_lea.vmem %s902_s2, %s445_s26  ;;  %506 = vmatprep.subr.bf16.mxu0 %v715_v0  ;;  %v516_v18 = vpack.c.bf16 %v237_v17, %v236_v16  ;;  %v519_v21 = vpack.c.bf16 %v239_v20, %v238_v19  ;;  %v240_v22 = vld [vmem:[#allocation3 + $0x60] sm:$0xff]  ;;  %v241_v23 = vld [vmem:[#allocation3 + $0x68] sm:$0xff]  ;;  %v242_v25 = vld [vmem:[#allocation3 + $0x70] sm:$0xff]  ;;  %s216_s6 = scalar_lea.vmem %s900_s0, %s445_s26 }
  0x3d   : > { %v320_v11 = vld [vmem:[%s220_s30] sm:$0xff]  ;;  %v522_v24 = vpack.c.bf16 %v241_v23, %v240_v22  ;;  %v243_v26 = vld [vmem:[#allocation3 + $0x78] sm:$0xff]  ;;  %s343_s11 = sshll.u32 %s209_s10, 4  ;;  %s330_s23 = scalar_lea.sflag [#allocation5], %s207_s7  ;;  %s855_s11 = int_to_ptr.vmem [resolvable:$true] %s343_s11 }
  0x3e   : > { %323 = vperm.xlu0 %599, %v320_v11   ;;  %v525_v27 = vpack.c.bf16 %v243_v26, %v242_v25  ;;  %v226_v28 = vld [vmem:[%s216_s6] sm:$0xff]  ;;  %s628_s28 = scalar_lea.vmem %s855_s11, 128  ;;  %p915_p10 = scmp.ne.s32.totalorder %s908_s22, 0 }
  0x3f   : > { %508 = vmatpush3.bf16.msra.mxu0 %v507_v8  ;;  %p629_p8 = scmp.ne.s32.totalorder %s855_s11, %s628_s28  ;;  %s719_s15 = smov [#allocation6]  }
  0x40   : > { %509 = vmatprep.subr.bf16.mxu0 %v715_v0  ;;  %s632_s26 = sshll.u32 %s719_s15, 4  ;;  %s633_s26 = int_to_ptr.vmem [resolvable:$false] %s632_s26 }
  0x41   : > { %p630_p11 = pnand %p629_p8, %p915_p10  ;;  %s634_s27 = scalar_lea.vmem %s633_s26, 256 }
  0x42   : > { %p635_p1 = scmp.lt.s32.totalorder %s855_s11, %s633_s26  ;;  %p636_p3 = scmp.lt.s32.totalorder %s634_s27, %s628_s28 }
  0x43   : > { %511 = vmatpush3.bf16.msra.mxu0 %v510_v12  ;;  %p631_p13 = pneg %p630_p11 }
  0x44   : > { %512 = vmatprep.subr.bf16.mxu0 %v715_v0  ;;  %p637_p5 = por %p636_p3, %p635_p1 }
  0x46   : > { %p638_p6 = pnand %p637_p5, %p631_p13 }
  0x47   : > { %514 = vmatpush3.bf16.msra.mxu0 %v513_v15 }
  0x48   : > { %515 = vmatprep.subr.bf16.mxu0 %v715_v0 }
  0x4b   : > { %517 = vmatpush3.bf16.msra.mxu0 %v516_v18 }
  0x4c   : > { %518 = vmatprep.subr.bf16.mxu0 %v715_v0 }
  0x4f   : > { %520 = vmatpush3.bf16.msra.mxu0 %v519_v21 }
  0x50   : > { %521 = vmatprep.subr.bf16.mxu0 %v715_v0 }
  0x53   : > { %523 = vmatpush3.bf16.msra.mxu0 %v522_v24 }
  0x54   : > { %524 = vmatprep.subr.bf16.mxu0 %v715_v0 }
  0x57   : > { %526 = vmatpush3.bf16.msra.mxu0 %v525_v27 }
  0x5a   : > { %501 = vmatmul.mubr.f32.vlgmr.msra.gmra.mrb[0].mxu0 %v226_v28 }
  0xbd   : > { %v324_v29 = vpop.permute.xlu0 %323 }
 0x12d   : > { %v310_v30 = vpop.f32.mrb[0].mxu0 }
 0x12e   : > { %v326_v31 = vmul.f32 %v324_v29, %v310_v30  ;;  %v502_v32 = vpop.f32.mrb[1].mxu0 }
 0x130   : > { %328 = vst [vmem:[%s209_s10] sm:$0xff] %v326_v31 }
 0x131   : > { %641 = shalt.err (!%p638_p6)
}
 0x132   : > { %s642_s29 = scalar_lea.hbm %s853_s21, 128  ;;  %s646_s5 = scalar_lea.hbm %s903_s3, 256 }
 0x133   : > { %p643_p7 = scmp.ne.s32.totalorder %s853_s21, %s642_s29  ;;  %p647_p0 = scmp.lt.u32.totalorder %s853_s21, %s903_s3 }
 0x134   : > { %p648_p2 = scmp.lt.u32.totalorder %s646_s5, %s642_s29  ;;  %p650_p8 = scmp.lt.u32.totalorder %s642_s29, %s853_s21 }
 0x135   : > { %p644_p9 = pnand %p643_p7, %p915_p10 }
 0x136   : > { %p649_p4 = por %p648_p2, %p647_p0 }
 0x137   : > { %p645_p12 = pneg %p644_p9 }
 0x138   : > { %p651_p11 = por %p650_p8, %p649_p4 }
 0x13a   : > { %p652_p13 = pnand %p651_p11, %p645_p12 }
 0x13c   : > { %655 = shalt.err (!%p652_p13)
}
 0x13d   : > { %531 = dma.vmem_to_hbm [thread:$0]  (%p915_p10), %s855_s11, 128, %s853_s21, %s330_s23  }
 0x13e PF: > { %p543_p1 = scmp.ge.s32.totalorder %s710_s17, 2  ;;  %s355_s8 = sand.u32 1, %s690_s12  }
 0x13f   : > { %p916_p3 = scmp.ne.s32.totalorder %s909_s24, 0  ;;  %s356_s9 = scalar_lea.sflag [#allocation5], %s355_s8 }
 0x141   : > { %p538_p5 = pnand %p543_p1, %p916_p3 }
 0x143   : > { %685 = dma.done.wait (!%p538_p5), %s356_s9, 128  }
 0x144   : > { %687 = vsyncadd (!%p538_p5), %s356_s9, 4294967168  ;;  %s17_s17 = sadd.s32 1, %s710_s17   ;;  %s917_s12 = smov %s694_s13 }
 0x145   : > { %p14_p6 = scmp.ge.s32.totalorder %s17_s17, 4   ;;  %s918_s13 = smov %s698_s14 }
 0x146   : > { %s919_s14 = smov %s793_s25  ;;  %s920_s15 = smov %s706_s16 }
 0x147   : > { %s921_s16 = smov %s923_s20  ;;  %16 = sbr.rel (!%p14_p6) target bundleno = 5 (0x5), region = 83 }
 0x14e   :  { %361 = vsyncpa [#allocation4], 1 }
 0x14f   :  { %363 = vsyncpa [#allocation4 + $0x1], 1 }
 0x150   :  { %364 = vsyncpa [#allocation5], 1 }
 0x151   :  { %366 = vsyncpa [#allocation5 + $0x1], 1 }

</bundles_post_ra>
